<compile_context>
chip_gen: v7x
topology: tpu7x:2x2x1
jax: 0.10.0
libtpu: 0.0.40
codegen_flags: <defaults>
</compile_context>

<pallas_src>
import jax
import jax.numpy as jnp
from jax.experimental import pallas as pl
from jax.experimental.pallas import tpu as pltpu

# Problem sizes (small, consistent with an image-classifier forward pass)
B = 2            # batch
CIN = 4          # input channels
H = W = 16       # spatial
KH = KW = 3      # conv kernel
FEAT = 32        # baseModel._fc.in_features (backbone feature width)
NUM_CLASSES = 5  # num_classes of the replaced _fc
HW = H * W
SPATIAL = B * H * W          # 512  -> lane axis (4 x 128)
PATCH = KH * KW * CIN        # 36   -> contraction dim


def classifier_kernel(patches_ref, wconv_ref, bconv_ref, poolmat_ref,
                      wfc_ref, bfc_ref, out_ref):
    """Fused conv(im2col-matmul) + swish + avg-pool(matmul) + fc(matmul).

    patches_ref : (PATCH, SPATIAL)      f32   im2col patch matrix (lane-dense)
    wconv_ref   : (FEAT, PATCH)         f32   conv weight, flattened+transposed
    bconv_ref   : (FEAT, 1)             f32   conv bias (column)
    poolmat_ref : (B, SPATIAL)          f32   block-diagonal / (H*W) pooling
    wfc_ref     : (NUM_CLASSES, FEAT)   f32   fc weight (transposed)
    bfc_ref     : (NUM_CLASSES, 1)      f32   fc bias (column)
    out_ref     : (NUM_CLASSES, B)      f32   logits (transposed)
    """
    # 3x3 SAME conv as one im2col matmul: (32,36) @ (36,512) -> (32,512)
    acc = jnp.dot(wconv_ref[...], patches_ref[...],
                  preferred_element_type=jnp.float32)
    acc = acc + bconv_ref[...]                       # bias broadcast over lanes

    # swish / SiLU: x * sigmoid(x)  (sigmoid -> EUP logistic, numerically safe)
    acc = acc * jax.nn.sigmoid(acc)

    # global average pool as an MXU matmul: (32,512) @ (B,512)^T -> (32,B)
    pooled = jax.lax.dot_general(
        acc, poolmat_ref[...],
        dimension_numbers=(((1,), (1,)), ((), ())),
        preferred_element_type=jnp.float32)

    # replaced _fc head: (NUM_CLASSES,FEAT) @ (FEAT,B) -> (NUM_CLASSES,B)
    logits = jnp.dot(wfc_ref[...], pooled,
                     preferred_element_type=jnp.float32) + bfc_ref[...]
    out_ref[...] = logits


def init_params(key):
    k1, k2, k3, k4 = jax.random.split(key, 4)
    return {
        "wconv": jax.random.normal(k1, (KH, KW, CIN, FEAT), jnp.float32) * 0.1,
        "bconv": jax.random.normal(k2, (1, FEAT), jnp.float32) * 0.1,
        "wfc":   jax.random.normal(k3, (FEAT, NUM_CLASSES), jnp.float32) * 0.1,
        "bfc":   jax.random.normal(k4, (1, NUM_CLASSES), jnp.float32) * 0.1,
    }


@jax.jit
def downstream_classifier(x_nchw, params):
    # NCHW (PyTorch) -> NHWC, SAME zero-padding for the 3x3 conv.
    x = jnp.transpose(x_nchw, (0, 2, 3, 1)).astype(jnp.float32)
    xpad = jnp.pad(x, ((0, 0), (1, 1), (1, 1), (0, 0)))

    # im2col in the wrapper: patch index p = kh*KW*CIN + kw*CIN + c,
    # spatial index s = b*H*W + h*W + w  ->  (PATCH, SPATIAL) lane-dense.
    slices = [xpad[:, kh:kh + H, kw:kw + W, :]
              for kh in range(KH) for kw in range(KW)]       # 9 x (B,H,W,CIN)
    patches = (jnp.stack(slices, axis=0)                     # (9,B,H,W,CIN)
               .transpose(0, 4, 1, 2, 3)                     # (9,CIN,B,H,W)
               .reshape(PATCH, SPATIAL))                     # (36,512)

    # Weight / bias re-layouts matching the transposed kernel dataflow.
    wconv2d = params["wconv"].reshape(PATCH, FEAT).T         # (FEAT,PATCH)
    bconv_c = params["bconv"].reshape(FEAT, 1)               # (FEAT,1)
    wfc_t = params["wfc"].T                                  # (NUM_CLASSES,FEAT)
    bfc_c = params["bfc"].reshape(NUM_CLASSES, 1)            # (NUM_CLASSES,1)

    # Block-diagonal average-pooling matrix: (B, B*H*W), rows sum to 1.
    pool_mat = jnp.repeat(jnp.eye(B, dtype=jnp.float32), HW, axis=1) / HW

    out_t = pl.pallas_call(
        classifier_kernel,
        out_shape=jax.ShapeDtypeStruct((NUM_CLASSES, B), jnp.float32),
        in_specs=[pl.BlockSpec(memory_space=pltpu.MemorySpace.VMEM)] * 6,
        out_specs=pl.BlockSpec(memory_space=pltpu.MemorySpace.VMEM),
    )(patches, wconv2d, bconv_c, pool_mat, wfc_t, bfc_c)
    return out_t.T                                           # (B, NUM_CLASSES)


def reference(x_nchw, params):
    # Pure-JAX reference of the same forward pass (for correctness check).
    x = jnp.transpose(x_nchw, (0, 2, 3, 1)).astype(jnp.float32)
    xpad = jnp.pad(x, ((0, 0), (1, 1), (1, 1), (0, 0)))
    acc = jnp.zeros((x.shape[0], H, W, FEAT), jnp.float32)
    for kh in range(KH):
        for kw in range(KW):
            acc = acc + jnp.einsum("bhwc,cf->bhwf",
                                   xpad[:, kh:kh + H, kw:kw + W, :],
                                   params["wconv"][kh, kw])
    acc = acc + params["bconv"]
    acc = acc * jax.nn.sigmoid(acc)
    pooled = jnp.mean(acc, axis=(1, 2))
    return pooled @ params["wfc"] + params["bfc"]


if __name__ == "__main__":
    key = jax.random.PRNGKey(0)
    kx, kp = jax.random.split(key)
    x = jax.random.normal(kx, (B, CIN, H, W), jnp.float32)  # PyTorch NCHW input
    params = init_params(kp)

    out = downstream_classifier(x, params)
    out = jax.block_until_ready(out)

    ref = reference(x, params)
    assert out.shape == (B, NUM_CLASSES)
    assert jnp.allclose(out, ref, atol=1e-4, rtol=1e-4)

    # TODO(synk): the real `baseModel` backbone is opaque in the source module;
    # a representative conv-stem + pool backbone is synthesized here.
    print("KERNEL_OK")
</pallas_src>

<mosaic_0001>
module attributes {stable_mosaic.version = 11 : i64} {
  func.func @classifier_kernel(%arg0: memref<36x512xf32, #tpu.memory_space<vmem>>, %arg1: memref<32x36xf32, #tpu.memory_space<vmem>>, %arg2: memref<32x1xf32, #tpu.memory_space<vmem>>, %arg3: memref<2x512xf32, #tpu.memory_space<vmem>>, %arg4: memref<5x32xf32, #tpu.memory_space<vmem>>, %arg5: memref<5x1xf32, #tpu.memory_space<vmem>>, %arg6: memref<5x2xf32, #tpu.memory_space<vmem>>) attributes {dimension_semantics = [], scalar_prefetch = 0 : i64, scratch_operands = 0 : i64, tpu.core_type = #tpu.core_type<tc>} {
    %c0 = arith.constant 0 : index
    %c0_0 = arith.constant 0 : index
    %0 = vector.load %arg1[%c0, %c0_0] : memref<32x36xf32, #tpu.memory_space<vmem>>, vector<32x36xf32>
    %c0_1 = arith.constant 0 : index
    %c0_2 = arith.constant 0 : index
    %1 = vector.load %arg0[%c0_1, %c0_2] : memref<36x512xf32, #tpu.memory_space<vmem>>, vector<36x512xf32>
    %cst = arith.constant dense<0.000000e+00> : vector<32x512xf32>
    %2 = tpu.matmul %0, %1, %cst {dimension_numbers = #tpu.dot_dimension_numbers<[1], [0], [0], [1], [0, 0, 1, 1], [], []>} : vector<32x36xf32>, vector<36x512xf32>, vector<32x512xf32> -> vector<32x512xf32>
    %c0_3 = arith.constant 0 : index
    %c0_4 = arith.constant 0 : index
    %3 = vector.load %arg2[%c0_3, %c0_4] : memref<32x1xf32, #tpu.memory_space<vmem>>, vector<32x1xf32>
    %4 = vector.broadcast %3 : vector<32x1xf32> to vector<32x512xf32>
    %5 = arith.addf %2, %4 : vector<32x512xf32>
    %6 = arith.negf %5 : vector<32x512xf32>
    %7 = math.exp %6 : vector<32x512xf32>
    %cst_5 = arith.constant 1.000000e+00 : f32
    %8 = vector.broadcast %cst_5 : f32 to vector<32x512xf32>
    %9 = arith.addf %8, %7 : vector<32x512xf32>
    %10 = arith.divf %8, %9 : vector<32x512xf32>
    %11 = arith.mulf %5, %10 : vector<32x512xf32>
    %c0_6 = arith.constant 0 : index
    %c0_7 = arith.constant 0 : index
    %12 = vector.load %arg3[%c0_6, %c0_7] : memref<2x512xf32, #tpu.memory_space<vmem>>, vector<2x512xf32>
    %cst_8 = arith.constant dense<0.000000e+00> : vector<32x2xf32>
    %13 = tpu.matmul %11, %12, %cst_8 {dimension_numbers = #tpu.dot_dimension_numbers<[1], [1], [0], [0], [0, 0, 1, 0], [], []>} : vector<32x512xf32>, vector<2x512xf32>, vector<32x2xf32> -> vector<32x2xf32>
    %c0_9 = arith.constant 0 : index
    %c0_10 = arith.constant 0 : index
    %14 = vector.load %arg4[%c0_9, %c0_10] : memref<5x32xf32, #tpu.memory_space<vmem>>, vector<5x32xf32>
    %cst_11 = arith.constant dense<0.000000e+00> : vector<5x2xf32>
    %15 = tpu.matmul %14, %13, %cst_11 {dimension_numbers = #tpu.dot_dimension_numbers<[1], [0], [0], [1], [0, 0, 1, 1], [], []>} : vector<5x32xf32>, vector<32x2xf32>, vector<5x2xf32> -> vector<5x2xf32>
    %c0_12 = arith.constant 0 : index
    %c0_13 = arith.constant 0 : index
    %16 = vector.load %arg5[%c0_12, %c0_13] : memref<5x1xf32, #tpu.memory_space<vmem>>, vector<5x1xf32>
    %17 = vector.broadcast %16 : vector<5x1xf32> to vector<5x2xf32>
    %18 = arith.addf %15, %17 : vector<5x2xf32>
    %c0_14 = arith.constant 0 : index
    %c0_15 = arith.constant 0 : index
    %19 = vector.load %arg6[%c0_14, %c0_15] : memref<5x2xf32, #tpu.memory_space<vmem>>, vector<5x2xf32>
    tpu.vector_store %arg6[%c0_14, %c0_15], %18 {strides = array<i32>} : memref<5x2xf32, #tpu.memory_space<vmem>>, vector<5x2xf32>,
    return
  }
}

</mosaic_0001>

<bundles_post_ra>
// kernel: downstream_classifier.1
= control target key start
LH: loop header
LB: loop body
LE: loop exit
PB: predicated region body
PF: predicated region fallthrough
CT: control target
= control target key end

     0   :  { %v814_v3 = vmov 0.0   ;;  %v815_v4 = vmov 0   ;;  %vm84_vm0 = vcmask 1043456   ;;  %vm71_vm1 = vcmask 293888   ;;  %s1040_s0 = inlined_call_operand.vmem [shape: f32[36,512], index: 0, kind: input, shape index: {}]   ;;  %s1041_s2 = inlined_call_operand.vmem [shape: f32[32,1], index: 2, kind: input, shape index: {}]   ;;  %s1042_s1 = inlined_call_operand.vmem [shape: f32[32,36], index: 1, kind: input, shape index: {}]   ;;  %s1043_s5 = inlined_call_operand.vmem [shape: f32[5,1], index: 5, kind: input, shape index: {}]   ;;  %s1044_s3 = inlined_call_operand.vmem [shape: f32[2,512], index: 3, kind: input, shape index: {}]   ;;  %s1045_s4 = inlined_call_operand.vmem [shape: f32[5,32], index: 4, kind: input, shape index: {}]   ;;  %s1046_s6 = inlined_call_operand.vmem [shape: f32[5,2], index: 6, kind: output, shape index: {}]  }
   0x1   :  { %v28_v0 = vld [vmem:[%s1040_s0 + $0x8] sm:$0xff]  ;;  %v27_v2 = vld [vmem:[%s1040_s0] sm:$0xff]  ;;  %161 = vmatprep.mubr.f32.mxu1 %v814_v3  ;;  %747 = vset.pattern.permute.xlu0 %v815_v4  ;;  %v30_v15 = vld [vmem:[%s1040_s0 + $0x18] sm:$0xff]  ;;  %v816_v39 = vmov 1983009808   ;;  %v393_v41 = vlaneseq  ;;  %vm818_vm2 = vmmov 0  }
   0x2   :  { %v32_v1 = vld [vmem:[%s1040_s0 + $0x28] sm:$0xff]  ;;  %v31_v6 = vld [vmem:[%s1040_s0 + $0x20] sm:$0xff]  ;;  %748 = vset.pattern.permute.xlu1 %v815_v4  ;;  %v34_v16 = vld [vmem:[%s1040_s0 + $0x38] sm:$0xff]  ;;  %v391_v40 = vunpack.c.l.s4 %v816_v39  ;;  %vm587_vm3 = vcmask 261120   ;;  %vm661_vm4 = vcmask 12288  }
   0x3   :  { %v712_v5 = vpack.c.bf16 %v32_v1, %v28_v0  ;;  %v36_v7 = vld [vmem:[%s1040_s0 + $0x48] sm:$0xff]  ;;  %v714_v9 = vpack.c.bf16 %v31_v6, %v27_v2  ;;  %v35_v11 = vld [vmem:[%s1040_s0 + $0x40] sm:$0xff]  ;;  %v29_v17 = vld [vmem:[%s1040_s0 + $0x10] sm:$0xff]  ;;  %v720_v23 = vpack.c.bf16 %v34_v16, %v30_v15  ;;  %v394_v43 = vshrl.u32 %v393_v41, 7 }
   0x4   :  { %v40_v8 = vld [vmem:[%s1040_s0 + $0x68] sm:$0xff]  ;;  %v39_v12 = vld [vmem:[%s1040_s0 + $0x60] sm:$0xff]  ;;  %v33_v18 = vld [vmem:[%s1040_s0 + $0x30] sm:$0xff]  ;;  %v392_v42 = vunpack.c.0.s8 %v391_v40 }
   0x5   :  { %v716_v10 = vpack.c.bf16 %v40_v8, %v36_v7  ;;  %713 = vmatprep.subr.bf16.mxu1 %v712_v5  ;;  %v718_v13 = vpack.c.bf16 %v39_v12, %v35_v11  ;;  %v44_v14 = vld [vmem:[%s1040_s0 + $0x88] sm:$0xf]  ;;  %v38_v19 = vld [vmem:[%s1040_s0 + $0x58] sm:$0xff]  ;;  %v47_v21 = vld [vmem:[%s1041_s2] sm:$0xff]  ;;  %v722_v26 = vpack.c.bf16 %v33_v18, %v29_v17 }
   0x6   :  { %715 = vmatpush1.bf16.msra.mxu1 %v714_v9  ;;  %v42_v20 = vld [vmem:[%s1040_s0 + $0x78] sm:$0xff]  ;;  %v43_v22 = vld [vmem:[%s1040_s0 + $0x80] sm:$0xf]  ;;  %53 = vperm.xlu0 %747, %v47_v21   ;;  %v49_v24 = vld [vmem:[%s1041_s2 + $0x10] sm:$0xff]  ;;  %v395_v44 = vsub.s32 %v392_v42, %v394_v43 }
   0x7   :  { %717 = vmatprep.subr.bf16.mxu1 %v716_v10  ;;  %v23_v25 = vld [vmem:[%s1042_s1] sm:$0xff]  ;;  %63 = vperm.xlu1 %748, %v49_v24   ;;  %v724_v27 = vpack.c.bf16 %v42_v20, %v38_v19  ;;  %v37_v28 = vld [vmem:[%s1040_s0 + $0x50] sm:$0xff]  ;;  %v48_v30 = vld [vmem:[%s1041_s2 + $0x8] sm:$0xff] }
   0x8   :  { %v41_v29 = vld [vmem:[%s1040_s0 + $0x70] sm:$0xff]  ;;  %v50_v31 = vld [vmem:[%s1041_s2 + $0x18] sm:$0xff]  ;;  %v24_v32 = vld [vmem:[%s1042_s1 + $0x8] sm:$0xff] }
   0x9   :  { %v726_v33 = vpack.c.bf16 %v41_v29, %v37_v28  ;;  %v46_v34 = vld [vmem:[%s1040_s0 + $0x98] sm:$0xf]  ;;  %v581_v35 = vld [vmem:[%s1043_s5] sm:$0x1f]  ;;  %v25_v36 = vld [vmem:[%s1042_s1 + $0x10] sm:$0xff] }
   0xa   :  { %719 = vmatpush1.bf16.msra.mxu1 %v718_v13  ;;  %58 = vperm.xlu0 %747, %v48_v30   ;;  %v45_v37 = vld [vmem:[%s1040_s0 + $0x90] sm:$0xf]  ;;  %v26_v38 = vld [vmem:[%s1042_s1 + $0x18] sm:$0xff]  ;;  %v387_v45 = vld [vmem:[%s1044_s3] sm:$0xff] }
   0xb   :  { %667 = vmatprep.subr.msk.mxu1 %vm84_vm0, %v44_v14  ;;  %68 = vperm.xlu1 %748, %v50_v31   ;;  %v396_v46 = vrot.slane %v387_v45, %v395_v44  ;;  %v389_v48 = vcombine.high %v387_v45, %v387_v45 }
   0xd   :  { %v404_v47 = vcombine.high %v396_v46, %v396_v46  ;;  %v964_v49 = vrot.slane %v389_v48, %v395_v44 }
   0xe   :  { %668 = vmatpush1.msk.msra.mxu1 %vm84_vm0, %v43_v22  ;;  %584 = vperm.xlu0 %747, %v581_v35  }
   0xf   :  { %669 = vmatmul.mubr.msk.f32.vlgmr.msra.gmra.mrb[0].mxu1 %vm71_vm1, %v23_v25  ;;  %721 = vmatprep.subr.bf16.mxu1 %v720_v23  ;;  %v405_v50 = vcombine.high %v964_v49, %v964_v49 }
  0x10   :  { %167 = vmatprep.mubr.f32.mxu1 %v814_v3  ;;  %723 = vmatpush1.bf16.msra.mxu1 %v722_v26 }
  0x11   :  { %725 = vmatprep.subr.bf16.mxu1 %v724_v27  ;;  %410 = vmatprep.subr.mxu0 %v404_v47 }
  0x12   :  { %411 = vmatpush1.xpose.msra.mxu0 %v396_v46 }
  0x13   :  { %670 = vmatmul.mubr.msk.f32.gmra.mrb[2].mxu1 %vm71_vm1, %v24_v32  ;;  %495 = vmatprep.subr.mxu0 %v405_v50 }
  0x14   :  { %173 = vmatprep.mubr.f32.mxu1 %v814_v3  ;;  %727 = vmatpush1.bf16.msra.mxu1 %v726_v33 }
  0x15   :  { %673 = vmatprep.subr.msk.mxu1 %vm84_vm0, %v46_v34 }
  0x17   :  { %671 = vmatmul.mubr.msk.f32.gmra.mrb[4].mxu1 %vm71_vm1, %v25_v36 }
  0x18   :  { %179 = vmatprep.mubr.f32.mxu1 %v814_v3  ;;  %674 = vmatpush1.msk.msra.mxu1 %vm84_vm0, %v45_v37 }
  0x1b   :  { %672 = vmatmul.mubr.msk.f32.gmra.mrb[6].mxu1 %vm71_vm1, %v26_v38 }
  0x1c   :  { %250 = vmatprep.mubr.f32.mxu1 %v814_v3 }
  0x1f   :  { %675 = vmatmul.mubr.msk.f32.vlgmr.msra.gmra.mrb[8].mxu1 %vm71_vm1, %v23_v25 }
  0x20   :  { %256 = vmatprep.mubr.f32.mxu1 %v814_v3 }
  0x23   :  { %676 = vmatmul.mubr.msk.f32.gmra.mrb[10].mxu1 %vm71_vm1, %v24_v32 }
  0x24   :  { %262 = vmatprep.mubr.f32.mxu1 %v814_v3 }
  0x27   :  { %677 = vmatmul.mubr.msk.f32.gmra.mrb[12].mxu1 %vm71_vm1, %v25_v36 }
  0x28   :  { %268 = vmatprep.mubr.f32.mxu1 %v814_v3 }
  0x2b   :  { %678 = vmatmul.mubr.msk.f32.gmra.mrb[14].mxu1 %vm71_vm1, %v26_v38 }
  0x85   :  { %v54_v51 = vpop.permute.xlu0 %53 }
  0x86   :  { %v64_v62 = vpop.permute.xlu1 %63 }
  0x89   :  { %v59_v57 = vpop.permute.xlu0 %58 }
  0x8a   :  { %v69_v8 = vpop.permute.xlu1 %68 }
  0xe2   :  { %v163_v52 = vpop.f32.mrb[0].mxu1 }
  0xe3   :  { %v968_v53 = vadd.f32 %v163_v52, %v54_v51  ;;  %v165_v54 = vpop.f32.mrb[1].mxu1 }
  0xe4   :  { %v970_v55 = vadd.f32 %v165_v54, %v54_v51 }
  0xe5   :  { %v679_v56 = vmul.f32 -1.442695, %v968_v53 }
  0xe6   :  { %v680_v58 = vmul.f32 -1.442695, %v970_v55  ;;  %v169_v59 = vpop.f32.mrb[2].mxu1 }
  0xe7   :  { %750 = vpow2.f32 %v679_v56  ;;  %v974_v60 = vadd.f32 %v169_v59, %v59_v57  ;;  %v171_v61 = vpop.f32.mrb[3].mxu1 }
  0xe8   :  { %752 = vpow2.f32 %v680_v58  ;;  %v976_v63 = vadd.f32 %v171_v61, %v59_v57 }
  0xe9   :  { %v683_v0 = vmul.f32 -1.442695, %v974_v60 }
  0xea   :  { %v684_v1 = vmul.f32 -1.442695, %v976_v63  ;;  %v175_v2 = vpop.f32.mrb[4].mxu1 }
  0xeb   :  { %754 = vpow2.f32 %v683_v0  ;;  %v980_v4 = vadd.f32 %v175_v2, %v64_v62  ;;  %v177_v5 = vpop.f32.mrb[5].mxu1 }
  0xec   :  { %756 = vpow2.f32 %v684_v1  ;;  %v982_v6 = vadd.f32 %v177_v5, %v64_v62 }
  0xed   :  { %v687_v7 = vmul.f32 -1.442695, %v980_v4 }
  0xee   :  { %v688_v9 = vmul.f32 -1.442695, %v982_v6  ;;  %v181_v10 = vpop.f32.mrb[6].mxu1 }
  0xef   :  { %758 = vpow2.f32 %v687_v7  ;;  %v986_v11 = vadd.f32 %v181_v10, %v69_v8  ;;  %v183_v12 = vpop.f32.mrb[7].mxu1 }
  0xf0   :  { %760 = vpow2.f32 %v688_v9  ;;  %v988_v13 = vadd.f32 %v183_v12, %v69_v8 }
  0xf1   :  { %v751_v14 = vpop.eup %750  ;;  %v691_v15 = vmul.f32 -1.442695, %v986_v11 }
  0xf2   :  { %v753_v16 = vpop.eup %752  ;;  %v323_v17 = vadd.f32 1.0, %v751_v14  ;;  %v692_v18 = vmul.f32 -1.442695, %v988_v13  ;;  %v252_v19 = vpop.f32.mrb[8].mxu1 }
  0xf3   :  { %v324_v20 = vadd.f32 1.0, %v753_v16  ;;  %762 = vpow2.f32 %v691_v15  ;;  %v992_v21 = vadd.f32 %v252_v19, %v54_v51  ;;  %v254_v22 = vpop.f32.mrb[9].mxu1 }
  0xf4   :  { %764 = vrcp.f32 %v323_v17  ;;  %v994_v23 = vadd.f32 %v254_v22, %v54_v51 }
  0xf5   :  { %v755_v24 = vpop.eup %754  ;;  %766 = vrcp.f32 %v324_v20  ;;  %v681_v25 = vmul.f32 -1.442695, %v992_v21 }
  0xf6   :  { %v757_v26 = vpop.eup %756  ;;  %v327_v27 = vadd.f32 1.0, %v755_v24  ;;  %768 = vpow2.f32 %v692_v18  ;;  %v682_v28 = vmul.f32 -1.442695, %v994_v23  ;;  %v258_v29 = vpop.f32.mrb[10].mxu1 }
  0xf7   :  { %v328_v30 = vadd.f32 1.0, %v757_v26  ;;  %770 = vpow2.f32 %v681_v25  ;;  %v998_v31 = vadd.f32 %v258_v29, %v59_v57  ;;  %v260_v32 = vpop.f32.mrb[11].mxu1 }
  0xf8   :  { %772 = vrcp.f32 %v327_v27  ;;  %v1000_v33 = vadd.f32 %v260_v32, %v59_v57 }
  0xf9   :  { %v759_v34 = vpop.eup %758  ;;  %774 = vrcp.f32 %v328_v30  ;;  %v685_v35 = vmul.f32 -1.442695, %v998_v31 }
  0xfa   :  { %v761_v36 = vpop.eup %760  ;;  %v331_v37 = vadd.f32 1.0, %v759_v34  ;;  %776 = vpow2.f32 %v682_v28  ;;  %v686_v38 = vmul.f32 -1.442695, %v1000_v33  ;;  %v264_v39 = vpop.f32.mrb[12].mxu1 }
  0xfb   :  { %v332_v40 = vadd.f32 1.0, %v761_v36  ;;  %778 = vpow2.f32 %v685_v35  ;;  %v1004_v41 = vadd.f32 %v264_v39, %v64_v62  ;;  %v266_v42 = vpop.f32.mrb[13].mxu1 }
  0xfc   :  { %780 = vrcp.f32 %v331_v37  ;;  %v1006_v43 = vadd.f32 %v266_v42, %v64_v62 }
  0xfd   :  { %v763_v44 = vpop.eup %762  ;;  %782 = vrcp.f32 %v332_v40  ;;  %v689_v45 = vmul.f32 -1.442695, %v1004_v41 }
  0xfe   :  { %v765_v46 = vpop.eup %764  ;;  %v335_v47 = vadd.f32 1.0, %v763_v44  ;;  %784 = vpow2.f32 %v686_v38  ;;  %v690_v48 = vmul.f32 -1.442695, %v1006_v43  ;;  %v270_v50 = vpop.f32.mrb[14].mxu1 }
  0xff   :  { %v767_v51 = vpop.eup %766  ;;  %786 = vpow2.f32 %v689_v45  ;;  %v1010_v52 = vadd.f32 %v270_v50, %v69_v8  ;;  %v272_v54 = vpop.f32.mrb[15].mxu1  ;;  %v371_v61 = vmul.f32 %v765_v46, %v968_v53 }
 0x100   :  { %v769_v56 = vpop.eup %768  ;;  %v1012_v57 = vadd.f32 %v272_v54, %v69_v8  ;;  %v372_v58 = vmul.f32 %v767_v51, %v970_v55  ;;  %788 = vpow2.f32 %v690_v48 }
 0x101   :  { %v771_v59 = vpop.eup %770  ;;  %v336_v62 = vadd.f32 1.0, %v769_v56  ;;  %v693_v0 = vmul.f32 -1.442695, %v1010_v52  ;;  %790 = vrcp.f32 %v335_v47 }
 0x102   :  { %v773_v1 = vpop.eup %772  ;;  %v325_v2 = vadd.f32 1.0, %v771_v59  ;;  %v694_v5 = vmul.f32 -1.442695, %v1012_v57  ;;  %474 = vmatprep.mubr.f32.mxu0 %v372_v58 }
 0x103   :  { %v775_v7 = vpop.eup %774  ;;  %792 = vrcp.f32 %v336_v62  ;;  %475 = vmatmul.mubr.f32.vlgmr.msra.gmra.mrb[0].mxu0 %v371_v61  ;;  %v375_v55 = vmul.f32 %v773_v1, %v974_v60 }
 0x104   :  { %v777_v8 = vpop.eup %776  ;;  %v376_v9 = vmul.f32 %v775_v7, %v976_v63  ;;  %794 = vrcp.f32 %v325_v2  ;;  %496 = vmatpush1.xpose.msra.mxu0 %v964_v49 }
 0x105   :  { %v779_v53 = vpop.eup %778  ;;  %v326_v10 = vadd.f32 1.0, %v777_v8  ;;  %796 = vpow2.f32 %v693_v0 }
 0x106   :  { %v781_v12 = vpop.eup %780  ;;  %v329_v14 = vadd.f32 1.0, %v779_v53  ;;  %798 = vpow2.f32 %v694_v5  ;;  %479 = vmatprep.mubr.f32.mxu0 %v376_v9 }
 0x107   :  { %v783_v15 = vpop.eup %782  ;;  %800 = vrcp.f32 %v326_v10  ;;  %480 = vmatmul.mubr.f32.gmra.mrb[2].mxu0 %v375_v55  ;;  %v379_v63 = vmul.f32 %v781_v12, %v980_v4 }
 0x108   :  { %v785_v16 = vpop.eup %784  ;;  %v380_v17 = vmul.f32 %v783_v15, %v982_v6  ;;  %802 = vrcp.f32 %v329_v14 }
 0x109   :  { %v787_v18 = vpop.eup %786  ;;  %v330_v19 = vadd.f32 1.0, %v785_v16 }
 0x10a   :  { %v333_v49 = vadd.f32 1.0, %v787_v18  ;;  %484 = vmatprep.mubr.f32.mxu0 %v380_v17  ;;  %v789_v60 = vpop.eup %788 }
 0x10b   :  { %804 = vrcp.f32 %v330_v19  ;;  %485 = vmatmul.mubr.f32.gmra.mrb[4].mxu0 %v379_v63  ;;  %v791_v20 = vpop.eup %790  ;;  %v334_v22 = vadd.f32 1.0, %v789_v60 }
 0x10c   :  { %806 = vrcp.f32 %v333_v49  ;;  %v383_v6 = vmul.f32 %v791_v20, %v986_v11 }
 0x10d   :  { %v793_v24 = vpop.eup %792  ;;  %808 = vrcp.f32 %v334_v22 }
 0x10e   :  { %v795_v25 = vpop.eup %794  ;;  %v384_v26 = vmul.f32 %v793_v24, %v988_v13 }
 0x10f   :  { %v797_v27 = vpop.eup %796  ;;  %v373_v34 = vmul.f32 %v795_v25, %v992_v21 }
 0x110   :  { %v799_v28 = vpop.eup %798  ;;  %v337_v4 = vadd.f32 1.0, %v797_v27  ;;  %489 = vmatprep.mubr.f32.mxu0 %v384_v26 }
 0x111   :  { %v801_v29 = vpop.eup %800  ;;  %v338_v30 = vadd.f32 1.0, %v799_v28  ;;  %490 = vmatmul.mubr.f32.gmra.mrb[6].mxu0 %v383_v6 }
 0x112   :  { %v374_v32 = vmul.f32 %v801_v29, %v994_v23  ;;  %810 = vrcp.f32 %v337_v4  ;;  %v803_v35 = vpop.eup %802 }
 0x113   :  { %812 = vrcp.f32 %v338_v30  ;;  %v377_v11 = vmul.f32 %v803_v35, %v998_v31 }
 0x114   :  { %559 = vmatprep.mubr.f32.mxu0 %v374_v32 }
 0x115   :  { %v805_v36 = vpop.eup %804  ;;  %560 = vmatmul.mubr.f32.vlgmr.msra.gmra.mrb[0].mxu0 %v373_v34 }
 0x116   :  { %v378_v13 = vmul.f32 %v805_v36, %v1000_v33  ;;  %v807_v37 = vpop.eup %806  ;;  %v817_v33 = vmov 0.0|0.0  }
 0x117   :  { %v809_v38 = vpop.eup %808  ;;  %v381_v23 = vmul.f32 %v807_v37, %v1004_v41  ;;  %728 = vmatprep.subr.bf16.mxu0 %v817_v33 }
 0x118   :  { %564 = vmatprep.mubr.f32.mxu0 %v378_v13  ;;  %v382_v39 = vmul.f32 %v809_v38, %v1006_v43 }
 0x119   :  { %565 = vmatmul.mubr.f32.gmra.mrb[2].mxu0 %v377_v11 }
 0x11a   :  { %569 = vmatprep.mubr.f32.mxu0 %v382_v39 }
 0x11c   :  { %v811_v40 = vpop.eup %810 }
 0x11d   :  { %v813_v21 = vpop.eup %812  ;;  %570 = vmatmul.mubr.f32.gmra.mrb[4].mxu0 %v381_v23  ;;  %v385_v44 = vmul.f32 %v811_v40, %v1010_v52  ;;  %v580_v52 = vld [vmem:[%s1045_s4] sm:$0x1f] }
 0x11e   :  { %v386_v42 = vmul.f32 %v813_v21, %v1012_v57 }
 0x120   :  { %574 = vmatprep.mubr.f32.mxu0 %v386_v42 }
 0x121   :  { %575 = vmatmul.mubr.f32.gmra.mrb[6].mxu0 %v385_v44 }
 0x122   :  { %709 = vmatprep.mubr.msk.f32.mxu0 %vm818_vm2, %v814_v3  ;;  %v585_v3 = vpop.permute.xlu0 %584 }
 0x1e8   :  { %v561_v31 = vpop.f32.mrb[0].mxu0 }
 0x1e9   :  { %v563_v43 = vpop.f32.mrb[1].mxu0 }
 0x1ec   :  { %v566_v45 = vpop.f32.mrb[2].mxu0 }
 0x1ed   :  { %v729_v46 = vpack.c.bf16 %v566_v45, %v561_v31  ;;  %v568_v41 = vpop.f32.mrb[3].mxu0 }
 0x1ef   :  { %730 = vmatpush3.bf16.msra.mxu0 %v729_v46 }
 0x1f0   :  { %v571_v47 = vpop.f32.mrb[4].mxu0  ;;  %731 = vmatprep.subr.bf16.mxu0 %v817_v33 }
 0x1f1   :  { %v573_v48 = vpop.f32.mrb[5].mxu0 }
 0x1f4   :  { %v576_v50 = vpop.f32.mrb[6].mxu0 }
 0x1f5   :  { %v732_v51 = vpack.c.bf16 %v576_v50, %v571_v47  ;;  %v578_v54 = vpop.f32.mrb[7].mxu0 }
 0x1f7   :  { %733 = vmatpush3.bf16.msra.mxu0 %v732_v51 }
 0x1fa   :  { %710 = vmatmul.mubr.msk.f32.vlgmr.msra.gmra.mrb[8].mxu0 %vm587_vm3, %v580_v52 }
 0x2cd   :  { %v657_v56 = vpop.f32.mrb[8].mxu0 }
 0x2ce   :  { %v658_v57 = vadd.f32 %v657_v56, %v585_v3  ;;  %v711_v58 = vpop.f32.mrb[9].mxu0 }
 0x2d0   :  { %662 = vst.msk [vmem:[%s1046_s6] sm:$0x1f] %vm661_vm4, %v658_v57 }

</bundles_post_ra>
